<compile_context>
chip_gen: v5e
topology: v5e:2x2
jax: 0.10.0
libtpu: 0.0.40
codegen_flags: <defaults>
</compile_context>

<pallas_src>
import functools

import jax
import jax.numpy as jnp
from jax.experimental import pallas as pl
from jax.experimental.pallas import tpu as pltpu


def _round_up(n, m):
    return ((n + m - 1) // m) * m


# ----------------------------- Pallas kernel ------------------------------ #
def _fused_mlp_kernel(*refs, acts):
    """Fused MLP forward over one batch tile.

    refs layout:
        refs[0]          : x_ref   (TILE_B, IN0)          VMEM
        refs[1 + 2*l]    : wT_ref  (IN_pad_l, OUT_pad_l)  VMEM (pre-transposed, zero-padded)
        refs[2 + 2*l]    : b_ref   (1, OUT_pad_l)         VMEM (f32, zero-padded)
        refs[-1]         : o_ref   (TILE_B, OUT_pad_last) VMEM (lane-dense)
    """
    x_ref = refs[0]
    o_ref = refs[-1]
    n_layers = len(acts)

    h = x_ref[...].astype(jnp.float32)
    for li in range(n_layers):  # static unroll over layers
        wT = refs[1 + 2 * li][...]          # (IN_pad_l, OUT_pad_l)
        b = refs[2 + 2 * li][...]           # (1, OUT_pad_l), f32
        # Feed the MXU in the weight dtype (f32 or bf16); accumulate in f32.
        y = jnp.dot(h.astype(wT.dtype), wT, preferred_element_type=jnp.float32)
        y = y + b                            # single broadcast per layer, f32 VPU math

        act = acts[li]
        if act == "relu":
            y = jnp.maximum(y, 0.0)
        elif act == "tanh":
            y = jnp.tanh(y)
        elif act == "sigmoid":
            # sigmoid(y) == 0.5*(tanh(0.5*y)+1): one EUP op instead of exp + divide.
            y = 0.5 * (jnp.tanh(0.5 * y) + 1.0)
        elif act == "identity":
            pass
        else:
            raise ValueError(f"unknown activation: {act}")
        h = y

    o_ref[...] = h.astype(o_ref.dtype)


# ------------------------- One-time parameter prep ------------------------- #
def prepare_fully_connected_params(params, param_dtype=jnp.float32):
    """Transpose to (IN, OUT), zero-pad every layer's output columns to a multiple
    of 128 lanes, and zero-pad the next layer's matching input ROWS (so padded
    activation lanes — even non-zero ones like sigmoid(0)=0.5 — contribute nothing).

    Run ONCE; the results are closed over by the jitted forward (no per-call XLA
    transposes/pads). Returns a list of (wT_padded, b_padded_2d).
    """
    prepared = []
    in_dim = params[0][0].shape[1]           # first layer input stays unpadded (matches x)
    for li, (w, b) in enumerate(params):
        out_f, in_f = w.shape
        out_pad = _round_up(out_f, 128)
        row_pad = in_dim - in_f              # 0 for the first layer
        wT = jnp.transpose(w)                # (in_f, out_f)
        wT = jnp.pad(wT, ((0, row_pad), (0, out_pad - out_f))).astype(param_dtype)
        b2d = jnp.pad(b.reshape(1, -1), ((0, 0), (0, out_pad - out_f))).astype(jnp.float32)
        prepared.append((wT, b2d))
        in_dim = out_pad
    return prepared


# ------------------------------- Wrapper ----------------------------------- #
def make_fully_connected_net(params, activations, *,
                             param_dtype=jnp.float32, max_tile_b=256):
    """Build a jitted fused forward for FullyConnectedNet.

    params: list of (w, b) with PyTorch layout w: (out, in), b: (out,).
    activations: list of "relu" | "tanh" | "sigmoid" | "identity".
    """
    assert len(params) == len(activations), \
        "Number of activations must be equal to the number of layers"
    acts = tuple(activations)
    out_f = params[-1][0].shape[0]
    out_pad = _round_up(out_f, 128)

    prepared = prepare_fully_connected_params(params, param_dtype)
    flat_params = [arr for pair in prepared for arr in pair]
    kernel = functools.partial(_fused_mlp_kernel, acts=acts)

    @jax.jit
    def forward(x):
        batch, in_f = x.shape
        tile_b = batch if batch <= max_tile_b else max_tile_b
        grid = (pl.cdiv(batch, tile_b),)

        # x / out are tiled over batch; weights & biases use constant index maps so
        # they stay VMEM-resident across grid steps.
        in_specs = [pl.BlockSpec((tile_b, in_f), lambda i: (i, 0))]
        for wT, b2d in prepared:
            in_specs.append(pl.BlockSpec(wT.shape, lambda i: (0, 0)))
            in_specs.append(pl.BlockSpec(b2d.shape, lambda i: (0, 0)))
        out_spec = pl.BlockSpec((tile_b, out_pad), lambda i: (i, 0))

        out = pl.pallas_call(
            kernel,
            out_shape=jax.ShapeDtypeStruct((batch, out_pad), x.dtype),
            grid=grid,
            in_specs=in_specs,
            out_specs=out_spec,
            compiler_params=pltpu.CompilerParams(
                dimension_semantics=("parallel",)),   # v7x: shard batch across both TCs
        )(x, *flat_params)

        # Slice lives inside this jit -> fuses with the kernel output (no extra copy).
        return out[:, :out_f]

    return forward


# --------------------------- Parameter creation ---------------------------- #
def init_fully_connected(key, input_size, neurons):
    """Deterministic init mimicking PyTorch nn.Linear default:
    U(-1/sqrt(fan_in), 1/sqrt(fan_in)) for both weight and bias."""
    params = []
    prev = input_size
    for n in neurons:
        key, kw, kb = jax.random.split(key, 3)
        bound = 1.0 / jnp.sqrt(prev)
        w = jax.random.uniform(kw, (n, prev), jnp.float32, -bound, bound)
        b = jax.random.uniform(kb, (n,), jnp.float32, -bound, bound)
        params.append((w, b))
        prev = n
    return params


# --------------------------------- Main ------------------------------------ #
if __name__ == "__main__":
    key = jax.random.PRNGKey(0)
    key, kx = jax.random.split(key)

    batch = 8
    input_size = 32
    neurons = [64, 48, 16]
    activations = ["relu", "tanh", "sigmoid"]

    x = jax.random.normal(kx, (batch, input_size), jnp.float32)
    params = init_fully_connected(key, input_size, neurons)

    # Build once (weight transpose/pad hoisted out of the call path), call many times.
    forward = make_fully_connected_net(params, activations)  # param_dtype=jnp.bfloat16 for v6e/v7x throughput
    out = forward(x)
    out = jax.block_until_ready(out)

    # Pure-JAX reference of the same math (PyTorch layout: x @ W.T + b).
    act_fns = {"relu": lambda v: jnp.maximum(v, 0.0),
               "tanh": jnp.tanh,
               "sigmoid": jax.nn.sigmoid,
               "identity": lambda v: v}
    ref = x
    for (w, b), a in zip(params, activations):
        ref = act_fns[a](ref @ w.T + b)

    assert out.shape == (batch, neurons[-1])
    assert jnp.allclose(out, ref, atol=1e-5, rtol=1e-5)

    print("KERNEL_OK")
</pallas_src>

<mosaic_0001>
module attributes {stable_mosaic.version = 11 : i64} {
  func.func @_fused_mlp_kernel(%arg0: i32, %arg1: memref<8x32xf32, #tpu.memory_space<vmem>>, %arg2: memref<32x128xf32, #tpu.memory_space<vmem>>, %arg3: memref<1x128xf32, #tpu.memory_space<vmem>>, %arg4: memref<128x128xf32, #tpu.memory_space<vmem>>, %arg5: memref<1x128xf32, #tpu.memory_space<vmem>>, %arg6: memref<128x128xf32, #tpu.memory_space<vmem>>, %arg7: memref<1x128xf32, #tpu.memory_space<vmem>>, %arg8: memref<8x128xf32, #tpu.memory_space<vmem>>) attributes {dimension_semantics = [#tpu.dimension_semantics<parallel>], iteration_bounds = array<i64: 1>, scalar_prefetch = 0 : i64, scratch_operands = 0 : i64, tpu.core_type = #tpu.core_type<tc>, window_params = [{transform_indices = @transform_0, window_bounds = array<i64: 8, 32>}, {pipeline_mode = #tpu.pipeline_mode<synchronous>, transform_indices = @transform_1, window_bounds = array<i64: 32, 128>}, {pipeline_mode = #tpu.pipeline_mode<synchronous>, transform_indices = @transform_2, window_bounds = array<i64: 1, 128>}, {pipeline_mode = #tpu.pipeline_mode<synchronous>, transform_indices = @transform_3, window_bounds = array<i64: 128, 128>}, {pipeline_mode = #tpu.pipeline_mode<synchronous>, transform_indices = @transform_4, window_bounds = array<i64: 1, 128>}, {pipeline_mode = #tpu.pipeline_mode<synchronous>, transform_indices = @transform_5, window_bounds = array<i64: 128, 128>}, {pipeline_mode = #tpu.pipeline_mode<synchronous>, transform_indices = @transform_6, window_bounds = array<i64: 1, 128>}, {transform_indices = @transform_7, window_bounds = array<i64: 8, 128>}]} {
    %c0 = arith.constant 0 : index
    %c0_0 = arith.constant 0 : index
    %0 = vector.load %arg1[%c0, %c0_0] : memref<8x32xf32, #tpu.memory_space<vmem>>, vector<8x32xf32>
    %c0_1 = arith.constant 0 : index
    %c0_2 = arith.constant 0 : index
    %1 = vector.load %arg2[%c0_1, %c0_2] : memref<32x128xf32, #tpu.memory_space<vmem>>, vector<32x128xf32>
    %c0_3 = arith.constant 0 : index
    %c0_4 = arith.constant 0 : index
    %2 = vector.load %arg3[%c0_3, %c0_4] : memref<1x128xf32, #tpu.memory_space<vmem>>, vector<1x128xf32>
    %cst = arith.constant dense<0.000000e+00> : vector<8x128xf32>
    %3 = tpu.matmul %0, %1, %cst {dimension_numbers = #tpu.dot_dimension_numbers<[1], [0], [0], [1], [0, 0, 1, 1], [], []>} : vector<8x32xf32>, vector<32x128xf32>, vector<8x128xf32> -> vector<8x128xf32>
    %4 = vector.broadcast %2 : vector<1x128xf32> to vector<8x128xf32>
    %5 = arith.addf %3, %4 : vector<8x128xf32>
    %cst_5 = arith.constant 0.000000e+00 : f32
    %6 = vector.broadcast %cst_5 : f32 to vector<8x128xf32>
    %7 = arith.maximumf %5, %6 : vector<8x128xf32>
    %c0_6 = arith.constant 0 : index
    %c0_7 = arith.constant 0 : index
    %8 = vector.load %arg4[%c0_6, %c0_7] : memref<128x128xf32, #tpu.memory_space<vmem>>, vector<128x128xf32>
    %c0_8 = arith.constant 0 : index
    %c0_9 = arith.constant 0 : index
    %9 = vector.load %arg5[%c0_8, %c0_9] : memref<1x128xf32, #tpu.memory_space<vmem>>, vector<1x128xf32>
    %cst_10 = arith.constant dense<0.000000e+00> : vector<8x128xf32>
    %10 = tpu.matmul %7, %8, %cst_10 {dimension_numbers = #tpu.dot_dimension_numbers<[1], [0], [0], [1], [0, 0, 1, 1], [], []>} : vector<8x128xf32>, vector<128x128xf32>, vector<8x128xf32> -> vector<8x128xf32>
    %11 = vector.broadcast %9 : vector<1x128xf32> to vector<8x128xf32>
    %12 = arith.addf %10, %11 : vector<8x128xf32>
    %13 = math.tanh %12 : vector<8x128xf32>
    %c0_11 = arith.constant 0 : index
    %c0_12 = arith.constant 0 : index
    %14 = vector.load %arg6[%c0_11, %c0_12] : memref<128x128xf32, #tpu.memory_space<vmem>>, vector<128x128xf32>
    %c0_13 = arith.constant 0 : index
    %c0_14 = arith.constant 0 : index
    %15 = vector.load %arg7[%c0_13, %c0_14] : memref<1x128xf32, #tpu.memory_space<vmem>>, vector<1x128xf32>
    %cst_15 = arith.constant dense<0.000000e+00> : vector<8x128xf32>
    %16 = tpu.matmul %13, %14, %cst_15 {dimension_numbers = #tpu.dot_dimension_numbers<[1], [0], [0], [1], [0, 0, 1, 1], [], []>} : vector<8x128xf32>, vector<128x128xf32>, vector<8x128xf32> -> vector<8x128xf32>
    %17 = vector.broadcast %15 : vector<1x128xf32> to vector<8x128xf32>
    %18 = arith.addf %16, %17 : vector<8x128xf32>
    %cst_16 = arith.constant 5.000000e-01 : f32
    %19 = vector.broadcast %cst_16 : f32 to vector<8x128xf32>
    %20 = arith.mulf %19, %18 : vector<8x128xf32>
    %21 = math.tanh %20 : vector<8x128xf32>
    %cst_17 = arith.constant 1.000000e+00 : f32
    %22 = vector.broadcast %cst_17 : f32 to vector<8x128xf32>
    %23 = arith.addf %21, %22 : vector<8x128xf32>
    %cst_18 = arith.constant 5.000000e-01 : f32
    %24 = vector.broadcast %cst_18 : f32 to vector<8x128xf32>
    %25 = arith.mulf %24, %23 : vector<8x128xf32>
    %c0_19 = arith.constant 0 : index
    %c0_20 = arith.constant 0 : index
    %26 = vector.load %arg8[%c0_19, %c0_20] : memref<8x128xf32, #tpu.memory_space<vmem>>, vector<8x128xf32>
    tpu.vector_store %arg8[%c0_19, %c0_20], %25 {strides = array<i32>} : memref<8x128xf32, #tpu.memory_space<vmem>>, vector<8x128xf32>,
    return
  }
  func.func @transform_0(%arg0: i32) -> (i32, i32) {
    %c0_i32 = arith.constant 0 : i32
    %c0_i32_0 = arith.constant 0 : i32
    return %arg0, %c0_i32 : i32, i32
  }
  func.func @transform_1(%arg0: i32) -> (i32, i32) {
    %c0_i32 = arith.constant 0 : i32
    %c0_i32_0 = arith.constant 0 : i32
    %c0_i32_1 = arith.constant 0 : i32
    return %c0_i32, %c0_i32_0 : i32, i32
  }
  func.func @transform_2(%arg0: i32) -> (i32, i32) {
    %c0_i32 = arith.constant 0 : i32
    %c0_i32_0 = arith.constant 0 : i32
    %c0_i32_1 = arith.constant 0 : i32
    return %c0_i32, %c0_i32_0 : i32, i32
  }
  func.func @transform_3(%arg0: i32) -> (i32, i32) {
    %c0_i32 = arith.constant 0 : i32
    %c0_i32_0 = arith.constant 0 : i32
    %c0_i32_1 = arith.constant 0 : i32
    return %c0_i32, %c0_i32_0 : i32, i32
  }
  func.func @transform_4(%arg0: i32) -> (i32, i32) {
    %c0_i32 = arith.constant 0 : i32
    %c0_i32_0 = arith.constant 0 : i32
    %c0_i32_1 = arith.constant 0 : i32
    return %c0_i32, %c0_i32_0 : i32, i32
  }
  func.func @transform_5(%arg0: i32) -> (i32, i32) {
    %c0_i32 = arith.constant 0 : i32
    %c0_i32_0 = arith.constant 0 : i32
    %c0_i32_1 = arith.constant 0 : i32
    return %c0_i32, %c0_i32_0 : i32, i32
  }
  func.func @transform_6(%arg0: i32) -> (i32, i32) {
    %c0_i32 = arith.constant 0 : i32
    %c0_i32_0 = arith.constant 0 : i32
    %c0_i32_1 = arith.constant 0 : i32
    return %c0_i32, %c0_i32_0 : i32, i32
  }
  func.func @transform_7(%arg0: i32) -> (i32, i32) {
    %c0_i32 = arith.constant 0 : i32
    %c0_i32_0 = arith.constant 0 : i32
    return %arg0, %c0_i32 : i32, i32
  }
}

</mosaic_0001>

<bundles_post_ra>
// kernel: forward.1
= control target key start
LH: loop header
LB: loop body
LE: loop exit
PB: predicated region body
PF: predicated region fallthrough
CT: control target
= control target key end

     0   :  { %12 = vsyncpa [#allocation3], 0  ;;  %s480_s0 = inlined_call_operand.hbm [shape: f32[8,32], index: 0, kind: input, shape index: {}]   ;;  %s481_s1 = inlined_call_operand.hbm [shape: f32[32,128], index: 1, kind: input, shape index: {}]   ;;  %s482_s2 = inlined_call_operand.hbm [shape: f32[1,128], index: 2, kind: input, shape index: {}]   ;;  %s483_s3 = inlined_call_operand.hbm [shape: f32[128,128], index: 3, kind: input, shape index: {}]   ;;  %s484_s4 = inlined_call_operand.vmem [shape: f32[1,128], index: 4, kind: input, shape index: {}]   ;;  %s485_s5 = inlined_call_operand.hbm [shape: f32[128,128], index: 5, kind: input, shape index: {}]   ;;  %s486_s6 = inlined_call_operand.vmem [shape: f32[1,128], index: 6, kind: input, shape index: {}]   ;;  %s487_s7 = inlined_call_operand.hbm [shape: f32[8,128], index: 7, kind: output, shape index: {}]  }
   0x1   :  { %13 = vsyncpa [#allocation6], 0 }
   0x2   :  { %14 = vsyncpa [#allocation9], 0  ;;  %s31_s26 = sshll.u32 %s481_s1, 4  ;;  %s32_s26 = int_to_ptr.hbm [resolvable:$true] %s31_s26 }
   0x3   :  { %15 = vsyncpa [#allocation4], 0  ;;  %s408_s27 = smov [#allocation5]   ;;  %s55_s8 = sshll.u32 %s483_s3, 4  ;;  %s56_s8 = int_to_ptr.hbm [resolvable:$true] %s55_s8 }
   0x4   :  { %s33_s28 = sshll.u32 %s408_s27, 4  ;;  %s409_s9 = smov 128   ;;  %s34_s28 = int_to_ptr.vmem [resolvable:$true] %s33_s28 }
   0x5   :  { %s410_s10 = smov 8   ;;  %s411_s11 = smov [#allocation8]  }
   0x6   :  { %39 = dma.hbm_to_vmem [thread:$0]  %s32_s26, 512, %s34_s28, [#allocation6], %s409_s9, %s409_s9, %s410_s10  }
   0x7   :  { %s57_s12 = sshll.u32 %s411_s11, 4  ;;  %s21_s15 = sshll.u32 %s480_s0, 4  ;;  %s58_s12 = int_to_ptr.vmem [resolvable:$true] %s57_s12  ;;  %s22_s15 = int_to_ptr.hbm [resolvable:$true] %s21_s15 }
   0x8   :  { %63 = dma.hbm_to_vmem [thread:$0]  %s56_s8, 2048, %s58_s12, [#allocation9], %s409_s9, %s409_s9, %s410_s10  }
   0x9   :  { %s45_s17 = sshll.u32 %s482_s2, 4  ;;  %s412_s18 = smov [#allocation2]   ;;  %s46_s17 = int_to_ptr.hbm [resolvable:$true] %s45_s17 }
   0xa   :  { %s23_s19 = sshll.u32 %s412_s18, 4  ;;  %s413_s3 = smov [#allocation7]   ;;  %s24_s19 = int_to_ptr.vmem [resolvable:$true] %s23_s19 }
   0xb   :  { %26 = dma.hbm_to_vmem [thread:$0]  %s22_s15, 128, %s24_s19, [#allocation3]  }
   0xc   :  { %s47_s20 = sshll.u32 %s413_s3, 4  ;;  %s70_s23 = sshll.u32 %s485_s5, 4  ;;  %s48_s20 = int_to_ptr.vmem [resolvable:$true] %s47_s20  ;;  %s71_s23 = int_to_ptr.hbm [resolvable:$true] %s70_s23 }
   0xd   :  { %50 = dma.hbm_to_vmem [thread:$0]  %s46_s17, 16, %s48_s20, [#allocation6]  }
   0xe   :  { %s414_s0 = smov [#allocation10]  }
   0xf   :  { %s72_s24 = sshll.u32 %s414_s0, 4  ;;  %s73_s24 = int_to_ptr.vmem [resolvable:$true] %s72_s24 }
  0x10   :  { %78 = dma.hbm_to_vmem [thread:$0]  %s71_s23, 2048, %s73_s24, [#allocation9], %s409_s9, %s409_s9, %s410_s10  }
  0x11   :  { %400 = dma.done.wait [#allocation3], 128  }
  0x12   :  { %401 = vsyncadd [#allocation3], 4294967168 }
  0x13   :  { %402 = dma.done.wait [#allocation6], 528  }
  0x14   :  { %403 = vsyncadd [#allocation6], 4294966768 }
  0x15   :  { %404 = dma.done.wait [#allocation9], 4096  }
  0x16   :  { %405 = vsyncadd [#allocation9], 4294963200  ;;  %v105_v0 = vld [vmem:[#allocation5 + $0x18] sm:$0xff]  ;;  %v104_v1 = vld [vmem:[#allocation5 + $0x10] sm:$0xff]  ;;  %vm110_vm0 = vcmask 261120   ;;  %s415_s27 = smov [#allocation11]  }
  0x17   :  { %126 = vmatpush.msra.mxu0 %v105_v0  ;;  %v150_v2 = vld [vmem:[#allocation8 + $0x78] sm:$0xff]  ;;  %v103_v3 = vld [vmem:[#allocation5 + $0x8] sm:$0xff]  ;;  %v149_v4 = vld [vmem:[#allocation8 + $0x70] sm:$0xff]  ;;  %s226_s28 = sshll.u32 %s415_s27, 4  ;;  %s227_s28 = int_to_ptr.vmem [resolvable:$true] %s226_s28 }
  0x18   :  { %155 = vmatpush.msra.mxu1 %v150_v2  ;;  %v148_v5 = vld [vmem:[#allocation8 + $0x68] sm:$0xff]  ;;  %v102_v6 = vld [vmem:[#allocation5] sm:$0xff]  ;;  %v101_v7 = vld [vmem:[#allocation2] sm:$0xff] }
  0x19   :  { %127 = vmatpush.msra.mxu0 %v104_v1  ;;  %v147_v8 = vld [vmem:[#allocation8 + $0x60] sm:$0xff]  ;;  %v146_v9 = vld [vmem:[#allocation8 + $0x58] sm:$0xff]  ;;  %v145_v10 = vld [vmem:[#allocation8 + $0x50] sm:$0xff] }
  0x1a   :  { %156 = vmatpush.msra.mxu1 %v149_v4  ;;  %v144_v11 = vld [vmem:[#allocation8 + $0x48] sm:$0xff]  ;;  %v143_v12 = vld [vmem:[#allocation8 + $0x40] sm:$0xff]  ;;  %v142_v13 = vld [vmem:[#allocation8 + $0x38] sm:$0xff] }
  0x1b   :  { %128 = vmatpush.msra.mxu0 %v103_v3  ;;  %v141_v14 = vld [vmem:[#allocation8 + $0x30] sm:$0xff]  ;;  %v140_v15 = vld [vmem:[#allocation8 + $0x28] sm:$0xff]  ;;  %v139_v16 = vld [vmem:[#allocation8 + $0x20] sm:$0xff] }
  0x1c   :  { %157 = vmatpush.msra.mxu1 %v148_v5  ;;  %v138_v17 = vld [vmem:[#allocation8 + $0x18] sm:$0xff]  ;;  %v137_v18 = vld [vmem:[#allocation8 + $0x10] sm:$0xff]  ;;  %v136_v19 = vld [vmem:[#allocation8 + $0x8] sm:$0xff] }
  0x1d   :  { %129 = vmatpush.msra.mxu0 %v102_v6  ;;  %v135_v20 = vld [vmem:[#allocation8] sm:$0xff]  ;;  %v191_v21 = vld [vmem:[#allocation10 + $0x78] sm:$0xff]  ;;  %v190_v22 = vld [vmem:[#allocation10 + $0x70] sm:$0xff] }
  0x1e   :  { %240 = vmatmul.msk.f32.vlgmr.msra.gmra.mxu0 %vm110_vm0, %v101_v7  ;;  %158 = vmatpush.msra.mxu1 %v147_v8  ;;  %v189_v23 = vld [vmem:[#allocation10 + $0x68] sm:$0xff]  ;;  %v188_v24 = vld [vmem:[#allocation10 + $0x60] sm:$0xff]  ;;  %v187_v25 = vld [vmem:[#allocation10 + $0x58] sm:$0xff] }
  0x1f   :  { %196 = vmatpush.msra.mxu2 %v191_v21  ;;  %v186_v26 = vld [vmem:[#allocation10 + $0x50] sm:$0xff]  ;;  %v185_v27 = vld [vmem:[#allocation10 + $0x48] sm:$0xff]  ;;  %v184_v28 = vld [vmem:[#allocation10 + $0x40] sm:$0xff] }
  0x20   :  { %159 = vmatpush.msra.mxu1 %v146_v9  ;;  %v183_v29 = vld [vmem:[#allocation10 + $0x38] sm:$0xff]  ;;  %v182_v30 = vld [vmem:[#allocation10 + $0x30] sm:$0xff]  ;;  %v181_v31 = vld [vmem:[#allocation10 + $0x28] sm:$0xff] }
  0x21   :  { %197 = vmatpush.msra.mxu2 %v190_v22  ;;  %v249_v32 = vld [vmem:[#allocation7] ss:$0 sm:$0xff]  ;;  %v180_v36 = vld [vmem:[#allocation10 + $0x20] sm:$0xff]  ;;  %v178_v38 = vld [vmem:[#allocation10 + $0x10] sm:$0xff] }
  0x22   :  { %160 = vmatpush.msra.mxu1 %v145_v10  ;;  %v179_v37 = vld [vmem:[#allocation10 + $0x18] sm:$0xff]  ;;  %v177_v39 = vld [vmem:[#allocation10 + $0x8] sm:$0xff]  ;;  %v176_v40 = vld [vmem:[#allocation10] sm:$0xff] }
  0x23   :  { %198 = vmatpush.msra.mxu2 %v189_v23  ;;  %v250_v41 = vld [vmem:[%s484_s4] ss:$0 sm:$0xff]  ;;  %s228_s4 = sshll.u32 %s487_s7, 4  ;;  %s229_s4 = int_to_ptr.hbm [resolvable:$true] %s228_s4 }
  0x24   :  { %161 = vmatpush.msra.mxu1 %v144_v11  ;;  %v251_v45 = vld [vmem:[%s486_s6] ss:$0 sm:$0xff] }
  0x25   :  { %199 = vmatpush.msra.mxu2 %v188_v24 }
  0x26   :  { %162 = vmatpush.msra.mxu1 %v143_v12 }
  0x27   :  { %200 = vmatpush.msra.mxu2 %v187_v25 }
  0x28   :  { %163 = vmatpush.msra.mxu1 %v142_v13 }
  0x29   :  { %201 = vmatpush.msra.mxu2 %v186_v26 }
  0x2a   :  { %164 = vmatpush.msra.mxu1 %v141_v14 }
  0x2b   :  { %202 = vmatpush.msra.mxu2 %v185_v27 }
  0x2c   :  { %165 = vmatpush.msra.mxu1 %v140_v15 }
  0x2d   :  { %203 = vmatpush.msra.mxu2 %v184_v28 }
  0x2e   :  { %166 = vmatpush.msra.mxu1 %v139_v16 }
  0x2f   :  { %204 = vmatpush.msra.mxu2 %v183_v29 }
  0x30   :  { %167 = vmatpush.msra.mxu1 %v138_v17 }
  0x31   :  { %205 = vmatpush.msra.mxu2 %v182_v30 }
  0x32   :  { %168 = vmatpush.msra.mxu1 %v137_v18 }
  0x33   :  { %206 = vmatpush.msra.mxu2 %v181_v31 }
  0x34   :  { %169 = vmatpush.msra.mxu1 %v136_v19 }
  0x35   :  { %207 = vmatpush.msra.mxu2 %v180_v36 }
  0x36   :  { %170 = vmatpush.msra.mxu1 %v135_v20 }
  0x37   :  { %208 = vmatpush.msra.mxu2 %v179_v37 }
  0x39   :  { %209 = vmatpush.msra.mxu2 %v178_v38 }
  0x3b   :  { %210 = vmatpush.msra.mxu2 %v177_v39 }
  0x3d   :  { %211 = vmatpush.msra.mxu2 %v176_v40 }
  0x9b   :  { %v131_v33 = vpop.f32.mrf.mxu0 }
  0x9c   :  { %v132_v34 = vadd.f32 %v249_v32, %v131_v33 }
  0x9e   :  { %v134_v35 = vmax.f32 %v132_v34, 0.0 }
  0xa0   :  { %171 = vmatmul.f32.vlgmr.msra.gmra.mxu1 %v134_v35 }
 0x11d   :  { %v172_v42 = vpop.f32.mrf.mxu1 }
 0x11e   :  { %v173_v43 = vadd.f32 %v250_v41, %v172_v42 }
 0x120   :  { %252 = vtanh.f32 %v173_v43 }
 0x126   :  { %v253_v44 = vpop.eup %252 }
 0x127   :  { %212 = vmatmul.f32.vlgmr.msra.gmra.mxu2 %v253_v44 }
 0x1aa   :  { %v213_v46 = vpop.f32.mrf.mxu2 }
 0x1ab   :  { %v214_v47 = vadd.f32 %v251_v45, %v213_v46 }
 0x1ad   :  { %v216_v48 = vmul.f32 0.5, %v214_v47 }
 0x1af   :  { %254 = vtanh.f32 %v216_v48 }
 0x1b5   :  { %v255_v49 = vpop.eup %254 }
 0x1b6   :  { %v218_v50 = vadd.f32 1.0, %v255_v49 }
 0x1b8   :  { %v219_v51 = vmul.f32 0.5, %v218_v50 }
 0x1ba   :  { %220 = vst [vmem:[#allocation11] sm:$0xff] %v219_v51 }
 0x1bb   :  { %231 = dma.vmem_to_hbm [thread:$0]  %s227_s28, 128, %s229_s4, [#allocation4]  }
 0x1bc   :  { %406 = dma.done.wait [#allocation4], 128  }
 0x1bd   :  { %407 = vsyncadd [#allocation4], 4294967168 }
 0x1be   :  { %236 = vsyncpa [#allocation3], 1 }
 0x1bf   :  { %237 = vsyncpa [#allocation6], 1 }
 0x1c0   :  { %238 = vsyncpa [#allocation9], 1 }
 0x1c1   :  { %239 = vsyncpa [#allocation4], 1 }

</bundles_post_ra>
